<compile_context>
chip_gen: v7x
topology: tpu7x:2x2x1
jax: 0.10.0
libtpu: 0.0.40
codegen_flags: <defaults>
</compile_context>

<pallas_src>
import functools

import jax
import jax.numpy as jnp
from jax.experimental import pallas as pl
from jax.experimental.pallas import tpu as pltpu


def _wmse_kernel(pred_ref, true_ref, w_ref, lvsum_ref, out_ref, acc_ref, *,
                 batch, reduction):
    part = pl.program_id(0)
    step = pl.program_id(1)

    @pl.when(step == 0)
    def _init():
        acc_ref[...] = jnp.zeros_like(acc_ref)

    # SmoothL1 (Huber, beta=1.0): 0.5*x^2 if |x|<1 else |x|-0.5.  Cast in-kernel only.
    x = pred_ref[...].astype(jnp.float32) - true_ref[...].astype(jnp.float32)   # (TR, 128)
    ax = jnp.abs(x)
    per_elem = jnp.where(ax < 1.0, 0.5 * x * x, ax - 0.5)                       # (TR, 128)
    acc_ref[...] += jnp.sum(per_elem, axis=0, keepdims=True)                    # (1, 128)

    @pl.when(step == pl.num_programs(1) - 1)
    def _finalize():
        # Lane j of acc holds the batch-sum for task (j % Tpad): weight + reduce once.
        weighted = jnp.sum(acc_ref[...] * w_ref[...], axis=-1, keepdims=True)   # (1, 1)
        if reduction == "mean":
            weighted = weighted * (1.0 / batch)
        # Add the sum(log_var) term exactly once (only on part 0).
        lv_term = jnp.where(part == 0, lvsum_ref[...], jnp.zeros_like(lvsum_ref[...]))
        out_ref[...] = 0.5 * (weighted + lv_term)


def weighted_mse_loss(y_pred, y_true, log_vars, *, reduction="mean",
                      block_rows=512, num_parts=2):
    """Pallas implementation of WeightedMSELoss.forward (reduction in {'mean','sum'})."""
    assert reduction in ("mean", "sum")
    B, T = y_pred.shape

    # Pad the task axis to a power of two so it divides the 128-lane width.  Padded
    # columns are zeros -> SmoothL1 contribution is exactly 0.
    Tpad = pl.next_power_of_2(max(int(T), 1))
    # TODO(synk): task_num > 128 would need per-row (not lane-periodic) weights.
    assert Tpad <= 128, "task_num > 128 not supported"
    if Tpad != T:
        y_pred = jnp.pad(y_pred, ((0, 0), (0, Tpad - T)))
        y_true = jnp.pad(y_true, ((0, 0), (0, Tpad - T)))

    # Lane-periodic per-task weights (lane j weights task j % Tpad) and sum(log_var).
    lv = log_vars.reshape(-1).astype(jnp.float32)
    w = jnp.exp(-lv)
    if Tpad != T:
        w = jnp.pad(w, (0, Tpad - T))          # padded-task lanes get weight 0
    w_lane = jnp.tile(w, 128 // Tpad).reshape(1, 128)
    lv_sum = jnp.sum(lv).reshape(1, 1)

    # Flatten (row-major) to a lane-dense (rows, 128) slab and tile rows over the grid.
    n = B * Tpad
    r0 = pl.cdiv(n, 128)
    tr = max(1, min(int(block_rows), int(pl.cdiv(r0, num_parts))))
    tr = ((tr + 7) // 8) * 8                                   # sublane multiple
    rows = int(pl.cdiv(r0, num_parts * tr)) * (num_parts * tr)
    inner = rows // (num_parts * tr)
    pad = rows * 128 - n

    def to_slab(a):
        flat = a.reshape(-1)
        if pad:
            flat = jnp.pad(flat, (0, pad))     # zero tail -> contributes 0
        return flat.reshape(rows, 128)

    pred_s = to_slab(y_pred)                   # native dtype, cast happens in-kernel
    true_s = to_slab(y_true)

    kernel = functools.partial(_wmse_kernel, batch=B, reduction=reduction)
    data_spec = pl.BlockSpec((tr, 128), lambda c, i: (c * inner + i, 0))

    partials = pl.pallas_call(
        kernel,
        out_shape=jax.ShapeDtypeStruct((num_parts, 1, 1), jnp.float32),
        grid=(num_parts, inner),
        in_specs=[
            data_spec,                                        # y_pred slab
            data_spec,                                        # y_true slab
            pl.BlockSpec((1, 128), lambda c, i: (0, 0)),      # exp(-log_var) per lane (resident)
            pl.BlockSpec((1, 1), lambda c, i: (0, 0)),        # sum(log_var) (resident)
        ],
        out_specs=pl.BlockSpec((None, 1, 1), lambda c, i: (c, 0, 0)),
        scratch_shapes=[pltpu.VMEM((1, 128), jnp.float32)],
        compiler_params=pltpu.CompilerParams(
            dimension_semantics=("parallel", "arbitrary"),
        ),
    )(pred_s, true_s, w_lane, lv_sum)

    return jnp.sum(partials)                   # tiny: num_parts scalars


def _reference(y_pred, y_true, log_vars, reduction="mean"):
    x = (y_pred - y_true).astype(jnp.float32)
    ax = jnp.abs(x)
    per_elem = jnp.where(ax < 1.0, 0.5 * x * x, ax - 0.5)
    diff = jnp.mean(per_elem, axis=0) if reduction == "mean" else jnp.sum(per_elem, axis=0)
    lv = log_vars.astype(jnp.float32)
    return 0.5 * jnp.sum(jnp.exp(-lv) * diff + lv)


if __name__ == "__main__":
    key = jax.random.PRNGKey(0)
    B, T = 4000, 6   # batch, task_num (exercises task padding, flat padding, multi-tile)
    k1, k2, k3 = jax.random.split(key, 3)
    y_pred = jax.random.normal(k1, (B, T), dtype=jnp.float32)
    y_true = jax.random.normal(k2, (B, T), dtype=jnp.float32)
    log_vars = 0.1 * jax.random.normal(k3, (T,), dtype=jnp.float32)

    ok = True
    for reduction in ("mean", "sum"):
        loss = weighted_mse_loss(y_pred, y_true, log_vars, reduction=reduction,
                                 block_rows=64, num_parts=2)
        loss = jax.block_until_ready(loss)
        ref = _reference(y_pred, y_true, log_vars, reduction=reduction)
        if not jnp.allclose(loss, ref, rtol=1e-4, atol=1e-5):
            ok = False
            print("MISMATCH", reduction, loss, ref)
    if ok:
        print("KERNEL_OK")
</pallas_src>

<mosaic_0001>
module attributes {stable_mosaic.version = 11 : i64} {
  func.func @_wmse_kernel(%arg0: i32, %arg1: i32, %arg2: memref<64x128xf32, #tpu.memory_space<vmem>>, %arg3: memref<64x128xf32, #tpu.memory_space<vmem>>, %arg4: memref<1x128xf32, #tpu.memory_space<vmem>>, %arg5: memref<1x1xf32, #tpu.memory_space<vmem>>, %arg6: memref<1x1x1xf32, #tpu.memory_space<vmem>>, %arg7: memref<1x128xf32, #tpu.memory_space<vmem>>) attributes {dimension_semantics = [#tpu.dimension_semantics<parallel>, #tpu.dimension_semantics<arbitrary>], iteration_bounds = array<i64: 2, 2>, scalar_prefetch = 0 : i64, scratch_operands = 1 : i64, tpu.core_type = #tpu.core_type<tc>, window_params = [{transform_indices = @transform_0, window_bounds = array<i64: 64, 128>}, {transform_indices = @transform_1, window_bounds = array<i64: 64, 128>}, {pipeline_mode = #tpu.pipeline_mode<synchronous>, transform_indices = @transform_2, window_bounds = array<i64: 1, 128>}, {pipeline_mode = #tpu.pipeline_mode<synchronous>, transform_indices = @transform_3, window_bounds = array<i64: 1, 1>}, {transform_indices = @transform_4, window_bounds = array<i64: 1, 1, 1>}]} {
    %c0_i32 = arith.constant 0 : i32
    %0 = arith.cmpi eq, %arg1, %c0_i32 : i32
    %1 = arith.extui %0 : i1 to i32
    %c0_i32_0 = arith.constant 0 : i32
    %2 = arith.cmpi ne, %1, %c0_i32_0 : i32
    scf.if %2 {
      %cst_12 = arith.constant 0.000000e+00 : f32
      %23 = vector.broadcast %cst_12 : f32 to vector<1x128xf32>
      %c0_13 = arith.constant 0 : index
      %c0_14 = arith.constant 0 : index
      %24 = vector.load %arg7[%c0_13, %c0_14] : memref<1x128xf32, #tpu.memory_space<vmem>>, vector<1x128xf32>
      tpu.vector_store %arg7[%c0_13, %c0_14], %23 {strides = array<i32>} : memref<1x128xf32, #tpu.memory_space<vmem>>, vector<1x128xf32>,
    } else {
    }
    %c0 = arith.constant 0 : index
    %c0_1 = arith.constant 0 : index
    %3 = vector.load %arg2[%c0, %c0_1] : memref<64x128xf32, #tpu.memory_space<vmem>>, vector<64x128xf32>
    %c0_2 = arith.constant 0 : index
    %c0_3 = arith.constant 0 : index
    %4 = vector.load %arg3[%c0_2, %c0_3] : memref<64x128xf32, #tpu.memory_space<vmem>>, vector<64x128xf32>
    %5 = arith.subf %3, %4 : vector<64x128xf32>
    %6 = math.absf %5 : vector<64x128xf32>
    %cst = arith.constant 1.000000e+00 : f32
    %7 = vector.broadcast %cst : f32 to vector<64x128xf32>
    %8 = arith.cmpf olt, %6, %7 : vector<64x128xf32>
    %cst_4 = arith.constant 5.000000e-01 : f32
    %9 = vector.broadcast %cst_4 : f32 to vector<64x128xf32>
    %10 = arith.mulf %9, %5 : vector<64x128xf32>
    %11 = arith.mulf %10, %5 : vector<64x128xf32>
    %cst_5 = arith.constant 5.000000e-01 : f32
    %12 = vector.broadcast %cst_5 : f32 to vector<64x128xf32>
    %13 = arith.subf %6, %12 : vector<64x128xf32>
    %14 = arith.select %8, %11, %13 : vector<64x128xi1>, vector<64x128xf32>
    %c0_6 = arith.constant 0 : index
    %c0_7 = arith.constant 0 : index
    %15 = vector.load %arg7[%c0_6, %c0_7] : memref<1x128xf32, #tpu.memory_space<vmem>>, vector<1x128xf32>
    %cst_8 = arith.constant dense<0.000000e+00> : vector<128xf32>
    %16 = vector.multi_reduction <add>, %14, %cst_8 [0] : vector<64x128xf32> to vector<128xf32>
    %17 = vector.shape_cast %16 : vector<128xf32> to vector<1x128xf32>
    %18 = arith.addf %15, %17 : vector<1x128xf32>
    %c0_9 = arith.constant 0 : index
    %c0_10 = arith.constant 0 : index
    %19 = vector.load %arg7[%c0_9, %c0_10] : memref<1x128xf32, #tpu.memory_space<vmem>>, vector<1x128xf32>
    tpu.vector_store %arg7[%c0_9, %c0_10], %18 {strides = array<i32>} : memref<1x128xf32, #tpu.memory_space<vmem>>, vector<1x128xf32>,
    %c1_i32 = arith.constant 1 : i32
    %20 = arith.cmpi eq, %arg1, %c1_i32 : i32
    %21 = arith.extui %20 : i1 to i32
    %c0_i32_11 = arith.constant 0 : i32
    %22 = arith.cmpi ne, %21, %c0_i32_11 : i32
    scf.if %22 {
      %c0_12 = arith.constant 0 : index
      %c0_13 = arith.constant 0 : index
      %23 = vector.load %arg7[%c0_12, %c0_13] : memref<1x128xf32, #tpu.memory_space<vmem>>, vector<1x128xf32>
      %c0_14 = arith.constant 0 : index
      %c0_15 = arith.constant 0 : index
      %24 = vector.load %arg4[%c0_14, %c0_15] : memref<1x128xf32, #tpu.memory_space<vmem>>, vector<1x128xf32>
      %25 = arith.mulf %23, %24 : vector<1x128xf32>
      %cst_16 = arith.constant dense<0.000000e+00> : vector<1xf32>
      %26 = vector.multi_reduction <add>, %25, %cst_16 [1] : vector<1x128xf32> to vector<1xf32>
      %27 = vector.shape_cast %26 : vector<1xf32> to vector<1x1xf32>
      %cst_17 = arith.constant 2.500000e-04 : f32
      %28 = vector.broadcast %cst_17 : f32 to vector<1x1xf32>
      %29 = arith.mulf %27, %28 : vector<1x1xf32>
      %c0_i32_18 = arith.constant 0 : i32
      %30 = arith.cmpi eq, %arg0, %c0_i32_18 : i32
      %c0_19 = arith.constant 0 : index
      %c0_20 = arith.constant 0 : index
      %31 = vector.load %arg5[%c0_19, %c0_20] : memref<1x1xf32, #tpu.memory_space<vmem>>, vector<1x1xf32>
      %cst_21 = arith.constant 0.000000e+00 : f32
      %32 = vector.broadcast %cst_21 : f32 to vector<1x1xf32>
      %33 = arith.select %30, %31, %32 : vector<1x1xf32>
      %34 = arith.addf %29, %33 : vector<1x1xf32>
      %cst_22 = arith.constant 5.000000e-01 : f32
      %35 = vector.broadcast %cst_22 : f32 to vector<1x1xf32>
      %36 = arith.mulf %35, %34 : vector<1x1xf32>
      %c0_23 = arith.constant 0 : index
      %c0_24 = arith.constant 0 : index
      %c0_25 = arith.constant 0 : index
      %37 = vector.load %arg6[%c0_23, %c0_24, %c0_25] : memref<1x1x1xf32, #tpu.memory_space<vmem>>, vector<1x1x1xf32>
      %38 = vector.shape_cast %37 : vector<1x1x1xf32> to vector<1x1xf32>
      %39 = vector.shape_cast %36 : vector<1x1xf32> to vector<1x1x1xf32>
      tpu.vector_store %arg6[%c0_23, %c0_24, %c0_25], %39 {strides = array<i32>} : memref<1x1x1xf32, #tpu.memory_space<vmem>>, vector<1x1x1xf32>,
    } else {
    }
    return
  }
  func.func @transform_0(%arg0: i32, %arg1: i32) -> (i32, i32) {
    %c2_i32 = arith.constant 2 : i32
    %0 = arith.muli %arg0, %c2_i32 : i32
    %1 = arith.addi %0, %arg1 : i32
    %c0_i32 = arith.constant 0 : i32
    %c0_i32_0 = arith.constant 0 : i32
    return %1, %c0_i32 : i32, i32
  }
  func.func @transform_1(%arg0: i32, %arg1: i32) -> (i32, i32) {
    %c2_i32 = arith.constant 2 : i32
    %0 = arith.muli %arg0, %c2_i32 : i32
    %1 = arith.addi %0, %arg1 : i32
    %c0_i32 = arith.constant 0 : i32
    %c0_i32_0 = arith.constant 0 : i32
    return %1, %c0_i32 : i32, i32
  }
  func.func @transform_2(%arg0: i32, %arg1: i32) -> (i32, i32) {
    %c0_i32 = arith.constant 0 : i32
    %c0_i32_0 = arith.constant 0 : i32
    %c0_i32_1 = arith.constant 0 : i32
    return %c0_i32, %c0_i32_0 : i32, i32
  }
  func.func @transform_3(%arg0: i32, %arg1: i32) -> (i32, i32) {
    %c0_i32 = arith.constant 0 : i32
    %c0_i32_0 = arith.constant 0 : i32
    %c0_i32_1 = arith.constant 0 : i32
    return %c0_i32, %c0_i32_0 : i32, i32
  }
  func.func @transform_4(%arg0: i32, %arg1: i32) -> (i32, i32, i32) {
    %c0_i32 = arith.constant 0 : i32
    %c0_i32_0 = arith.constant 0 : i32
    %c0_i32_1 = arith.constant 0 : i32
    return %arg0, %c0_i32, %c0_i32_0 : i32, i32, i32
  }
}

</mosaic_0001>

<bundles_post_ra>
// kernel: tpu_custom_call.1
= control target key start
LH: loop header
LB: loop body
LE: loop exit
PB: predicated region body
PF: predicated region fallthrough
CT: control target
= control target key end

     0   :  { %s1048_s0 = inlined_call_operand.hbm [shape: f32[256,128], index: 0, kind: input, shape index: {}]   ;;  %s1049_s1 = inlined_call_operand.hbm [shape: f32[256,128], index: 1, kind: input, shape index: {}]   ;;  %s1050_s2 = inlined_call_operand.vmem [shape: f32[1,128], index: 2, kind: input, shape index: {}]   ;;  %s1051_s3 = inlined_call_operand.<no memory space> [shape: f32[1,1], index: 3, kind: input, shape index: {}]   ;;  %s1052_s4 = inlined_call_operand.vmem [shape: f32[2,1,1], index: 4, kind: output, shape index: {}]  }
   0x1   :  { %v9_v0 = vstv %s1051_s3 }
   0x2   :  { %10 = vst [vmem:[#allocation3] sm:$0x1] %v9_v0 }
   0x3   :  { %11 = vsyncpa [#allocation5], 0 }
   0x4   :  { %13 = vsyncpa [#allocation5 + $0x1], 0 }
   0x5   :  { %14 = vsyncpa [#allocation7], 0 }
   0x6   :  { %16 = vsyncpa [#allocation7 + $0x1], 0  ;;  %s775_s17 = smov 0   ;;  %s777_s18 = smov 0  }
   0x7   :  { %s779_s19 = smov 0   ;;  %s781_s20 = smov 0  }
   0x8   :  { %s783_s21 = smov 0   ;;  %s785_s22 = smov 0  }
   0x9   :  { %s787_s23 = smov 0   ;;  %s789_s3 = smov 0  }
   0xa LB: > { %s498_s24 = sadd.s32 4294967295, %s740_s3   ;;  %s31_s25 = sadd.s32 1, %s732_s22  ;;  %s740_s3 = sphi %s789_s3, %s22_s3   ;;  %s736_s23 = sphi %s787_s23, %s1075_s23   ;;  %s732_s22 = sphi %s785_s22, %s1074_s22   ;;  %s728_s21 = sphi %s783_s21, %s1073_s21   ;;  %s724_s20 = sphi %s781_s20, %s1072_s20   ;;  %s720_s19 = sphi %s779_s19, %s1071_s19   ;;  %s716_s18 = sphi %s777_s18, %s1070_s18   ;;  %s712_s17 = sphi %s775_s17, %s1069_s17  }
   0xb   : > { %p32_p0 = scmp.ge.s32.totalorder %s31_s25, 2  ;;  %s34_s26 = sadd.s32 1, %s736_s23 }
   0xc   : > { %s500_s27 = sshll.u32 %s736_s23, 1  ;;  %s45_s28 = sadd.s32 1, %s720_s19 }
   0xd   : > { %s1077_s25 = smov (%p32_p0, %s31_s25), 0  ;;  %s1079_s26 = smov (!%p32_p0, %s34_s26), %s736_s23 }
   0xe   : > { %s822_s29 = sadd.s32 %s732_s22, %s500_s27  ;;  %p52_p1 = scmp.ne.s32.totalorder %s720_s19, %s716_s18 }
   0xf   : > { %p36_p2 = scmp.ge.s32.totalorder %s1079_s26, 2  ;;  %p53_p3 = scmp.eq.s32.totalorder %s740_s3, 0 }
  0x10   : > { %p58_p4 = scmp.ne.s32.totalorder %s716_s18, %s712_s17  ;;  %p59_p5 = scmp.eq.s32.totalorder %s498_s24, 0 }
  0x11   : > { %s1081_s26 = smov (%p36_p2, %s1079_s26), 0  ;;  %p830_p6 = por %p53_p3, %p52_p1 }
  0x12   : > { %p834_p7 = por %p59_p5, %p58_p4  ;;  %s501_s6 = sshll.u32 %s1081_s26, 1 }
  0x13   : > { %s41_s7 = sadd.s32 %s501_s6, %s1077_s25  ;;  %p542_p8 = scmp.lt.s32.totalorder %s740_s3, 4 }
  0x14   : > { %s1055_s5 = scalar_select %p834_p7, 1, 0 }
  0x15   : > { %s42_s8 = ssub.s32 %s822_s29, %s41_s7  ;;  %s843_s9 = sand.u32 1, %s720_s19  }
  0x16   : > { %p43_p9 = scmp.eq.s32.totalorder %s42_s8, 0  ;;  %s506_s10 = sshll.u32 %s843_s9, 6 }
  0x17   : > { %s529_s11 = sshll.u32 %s822_s29, 10  ;;  %s190_s16 = scalar_lea.vmem [#allocation4], %s506_s10 }
  0x18   : > { %s848_s12 = scalar_select %p43_p9, %s720_s19, %s45_s28  }
  0x19   : > { %s855_s15 = scalar_lea.hbm %s1048_s0, %s529_s11  ;;  %s199_s17 = sshll.u32 %s190_s16, 4  ;;  %s865_s17 = int_to_ptr.vmem [resolvable:$true] %s199_s17 }
  0x1a   : > { %p861_p10 = pnand %p542_p8, %p830_p6  ;;  %s187_s27 = scalar_lea.sflag [#allocation5], %s843_s9 }
  0x1b   : > { %s610_s28 = scalar_lea.hbm %s855_s15, 1024  ;;  %s615_s30 = scalar_lea.hbm %s1048_s0, 4096 }
  0x1c   : > { %p611_p11 = scmp.ne.s32.totalorder %s855_s15, %s610_s28  ;;  %p612_p12 = pneg %p861_p10 }
  0x1d   : > { %p616_p1 = scmp.lt.u32.totalorder %s855_s15, %s1048_s0  ;;  %p617_p2 = scmp.lt.u32.totalorder %s615_s30, %s610_s28 }
  0x1e   : > { %p613_p13 = pnand %p612_p12, %p611_p11  ;;  %p619_p4 = scmp.lt.u32.totalorder %s610_s28, %s855_s15 }
  0x1f   : > { %p618_p3 = por %p617_p2, %p616_p1 }
  0x20   : > { %p614_p0 = pneg %p613_p13 }
  0x21   : > { %p620_p5 = por %p619_p4, %p618_p3 }
  0x23   : > { %p621_p6 = pnand %p620_p5, %p614_p0 }
  0x25   : > { %624 = shalt.err (!%p621_p6)
}
  0x26   : > { %s625_s14 = scalar_lea.vmem %s865_s17, 1024  ;;  %s742_s16 = smov [#allocation4]  }
  0x27   : > { %p626_p8 = scmp.ne.s32.totalorder %s865_s17, %s625_s14  ;;  %s630_s6 = sshll.u32 %s742_s16, 4  ;;  %s631_s6 = int_to_ptr.vmem [resolvable:$false] %s630_s6 }
  0x28   : > { %s632_s7 = scalar_lea.vmem %s631_s6, 2048  ;;  %p633_p13 = scmp.lt.s32.totalorder %s865_s17, %s631_s6 }
  0x29   : > { %p628_p9 = pnand %p626_p8, %p612_p12  ;;  %p634_p1 = scmp.lt.s32.totalorder %s632_s7, %s625_s14 }
  0x2b   : > { %p629_p11 = pneg %p628_p9  ;;  %p635_p2 = por %p634_p1, %p633_p13 }
  0x2d   : > { %p636_p3 = pnand %p635_p2, %p629_p11 }
  0x2f   : > { %639 = shalt.err (!%p636_p3)
}
  0x30   : > { %s743_s28 = smov 128   ;;  %s744_s30 = smov 8  }
  0x31   : > { %538 = dma.hbm_to_vmem [thread:$0]  (!%p861_p10), %s855_s15, 1024, %s865_s17, %s187_s27, %s743_s28, %s743_s28, %s744_s30  }
  0x32   : > { %p514_p0 = scmp.ge.s32.totalorder %s740_s3, 1  ;;  %p230_p4 = scmp.lt.s32.totalorder %s740_s3, 5 }
  0x33   : > { %s909_s16 = scalar_lea.hbm %s1049_s1, %s529_s11  ;;  %s213_s6 = scalar_lea.vmem [#allocation6], %s506_s10 }
  0x34   : > { %p900_p5 = pnand %p514_p0, %p230_p4  ;;  %s222_s7 = sshll.u32 %s213_s6, 4  ;;  %s913_s7 = int_to_ptr.vmem [resolvable:$true] %s222_s7 }
  0x35   : > { %s210_s15 = scalar_lea.sflag [#allocation7], %s843_s9  ;;  %s640_s17 = scalar_lea.hbm %s909_s16, 1024 }
  0x36   : > { %p641_p6 = scmp.ne.s32.totalorder %s909_s16, %s640_s17  ;;  %s645_s11 = scalar_lea.hbm %s1049_s1, 4096 }
  0x37   : > { %p646_p11 = scmp.lt.u32.totalorder %s909_s16, %s1049_s1  ;;  %p647_p13 = scmp.lt.u32.totalorder %s645_s11, %s640_s17 }
  0x38   : > { %p643_p8 = pnand %p641_p6, %p612_p12  ;;  %p649_p2 = scmp.lt.u32.totalorder %s640_s17, %s909_s16 }
  0x39   : > { %p648_p1 = por %p647_p13, %p646_p11 }
  0x3a   : > { %p644_p9 = pneg %p643_p8 }
  0x3b   : > { %p650_p3 = por %p649_p2, %p648_p1 }
  0x3d   : > { %p651_p0 = pnand %p650_p3, %p644_p9 }
  0x3f   : > { %654 = shalt.err (!%p651_p0)
}
  0x40   : > { %s655_s10 = scalar_lea.vmem %s913_s7, 1024  ;;  %s745_s6 = smov [#allocation6]  }
  0x41   : > { %p656_p4 = scmp.ne.s32.totalorder %s913_s7, %s655_s10  ;;  %s660_s29 = sshll.u32 %s745_s6, 4  ;;  %s661_s29 = int_to_ptr.vmem [resolvable:$false] %s660_s29 }
  0x42   : > { %s662_s27 = scalar_lea.vmem %s661_s29, 2048  ;;  %p663_p7 = scmp.lt.s32.totalorder %s913_s7, %s661_s29 }
  0x43   : > { %p658_p6 = pnand %p656_p4, %p612_p12  ;;  %p664_p11 = scmp.lt.s32.totalorder %s662_s27, %s655_s10 }
  0x45   : > { %p659_p8 = pneg %p658_p6  ;;  %p665_p13 = por %p664_p11, %p663_p7 }
  0x47   : > { %p666_p1 = pnand %p665_p13, %p659_p8 }
  0x49   : > { %669 = shalt.err (!%p666_p1)
}
  0x4a   : > { %541 = dma.hbm_to_vmem [thread:$0]  (!%p861_p10), %s909_s16, 1024, %s913_s7, %s210_s15, %s743_s28, %s743_s28, %s744_s30  }
  0x4b   : > { %234 = sbr.rel (%p900_p5) target bundleno = 296 (0x128), region = 36  ;;  %s236_s17 = sand.u32 (!%p900_p5), 1, %s716_s18  }
  0x4c   : > { %s515_s11 = sshll.u32 (!%p900_p5), %s236_s17, 6  ;;  %s237_s13 = scalar_lea.sflag (!%p900_p5), [#allocation5], %s236_s17 }
  0x4d   : > { %s947_s14 = scalar_lea.vmem (!%p900_p5), [#allocation4], %s515_s11  ;;  %p1058_p7 = scmp.ne.s32.totalorder (!%p900_p5), %s1055_s5, 0 }
  0x52   : > { %703 = dma.done.wait (%p1058_p7), %s237_s13, 1024  }
  0x53   : > { %705 = vsyncadd (%p1058_p7), %s237_s13, 4294966272  ;;  %s246_s9 = scalar_lea.sflag [#allocation7], %s236_s17  ;;  %s953_s24 = scalar_lea.vmem [#allocation6], %s515_s11 }
  0x54   : > { %707 = dma.done.wait (%p1058_p7), %s246_s9, 1024  }
  0x55   : > { %709 = vsyncadd (%p1058_p7), %s246_s9, 4294966272  ;;  %p283_p10 = scmp.lt.s32.totalorder %s728_s21, 1  ;;  %p517_p12 = scmp.ne.s32.totalorder %s724_s20, 0 }
  0x56   : > { %v746_v1 = vmov (!%p517_p12), 0.0  }
  0x57   : > { %s961_s28 = scalar_select %p283_p10, %s728_s21, 1 }
  0x58   : > { %289 = sbr.rel (%p517_p12) target bundleno = 95 (0x5f), region = 48  ;;  %290 = vst [vmem:[#allocation2] sm:$0x1] (!%p517_p12), %v746_v1 }
  0x59   : > { %s285_s16 = scalar_lea.vmem %s1052_s4, %s961_s28 }
  0x5f PF: > { %v291_v2 = vld [vmem:[%s947_s14] sm:$0xff]  ;;  %v292_v3 = vld [vmem:[%s947_s14 + $0x8] sm:$0xff]  ;;  %v293_v5 = vld [vmem:[%s947_s14 + $0x10] sm:$0xff]  ;;  %p526_p5 = scmp.ne.s32.totalorder %s724_s20, 1 }
  0x60   : > { %v299_v4 = vld [vmem:[%s953_s24] sm:$0xff]  ;;  %v300_v6 = vld [vmem:[%s953_s24 + $0x8] sm:$0xff]  ;;  %v301_v7 = vld [vmem:[%s953_s24 + $0x10] sm:$0xff]  ;;  %vm386_vm8 = vcmask (!%p526_p5), 1040384   ;;  %p391_p9 = scmp.eq.s32.totalorder (!%p526_p5), %s728_s21, 0  ;;  %vm399_vm10 = vcmask (!%p526_p5), 0  }
  0x61   : > { %v294_v8 = vld [vmem:[%s947_s14 + $0x18] sm:$0xff]  ;;  %v295_v10 = vld [vmem:[%s947_s14 + $0x20] sm:$0xff]  ;;  %v307_v12 = vsub.f32 %v291_v2, %v299_v4  ;;  %v308_v13 = vsub.f32 %v292_v3, %v300_v6  ;;  %v309_v14 = vsub.f32 %v293_v5, %v301_v7  ;;  %v296_v15 = vld [vmem:[%s947_s14 + $0x28] sm:$0xff] }
  0x62   : > { %v302_v9 = vld [vmem:[%s953_s24 + $0x18] sm:$0xff]  ;;  %v303_v11 = vld [vmem:[%s953_s24 + $0x20] sm:$0xff]  ;;  %v297_v17 = vld [vmem:[%s947_s14 + $0x30] sm:$0xff] }
  0x63   : > { %v310_v16 = vsub.f32 %v294_v8, %v302_v9  ;;  %v304_v18 = vld [vmem:[%s953_s24 + $0x28] sm:$0xff]  ;;  %v305_v19 = vld [vmem:[%s953_s24 + $0x30] sm:$0xff]  ;;  %v311_v20 = vsub.f32 %v295_v10, %v303_v11  ;;  %v298_v21 = vld [vmem:[%s947_s14 + $0x38] sm:$0xff]  ;;  %v315_v23 = vand.u32 2147483647, %v307_v12  ;;  %v331_v26 = vmul.f32 0.5, %v307_v12 }
  0x64   : > { %v306_v22 = vld [vmem:[%s953_s24 + $0x38] sm:$0xff]  ;;  %v316_v24 = vand.u32 2147483647, %v308_v13  ;;  %v317_v25 = vand.u32 2147483647, %v309_v14  ;;  %v332_v27 = vmul.f32 0.5, %v308_v13  ;;  %v312_v29 = vsub.f32 %v296_v15, %v304_v18 }
  0x65   : > { %v333_v28 = vmul.f32 0.5, %v309_v14  ;;  %v313_v30 = vsub.f32 %v297_v17, %v305_v19  ;;  %v318_v31 = vand.u32 2147483647, %v310_v16  ;;  %v334_v32 = vmul.f32 0.5, %v310_v16  ;;  %v363_v19 = vld [vmem:[#allocation2] sm:$0x1] }
  0x66   : > { %v314_v33 = vsub.f32 %v298_v21, %v306_v22  ;;  %v319_v34 = vand.u32 2147483647, %v311_v20  ;;  %v339_v35 = vmul.f32 %v331_v26, %v307_v12  ;;  %v340_v36 = vmul.f32 %v332_v27, %v308_v13  ;;  %v392_v27 = vld [vmem:[#allocation3] sm:$0x1] (!%p526_p5) }
  0x67   : > { %vm984_vm0 = vcmp.lt.f32.partialorder %v315_v23, 1.0  ;;  %vm988_vm1 = vcmp.lt.f32.partialorder %v316_v24, 1.0  ;;  %v335_v39 = vmul.f32 0.5, %v311_v20  ;;  %v341_v40 = vmul.f32 %v333_v28, %v309_v14 }
  0x68   : > { %vm992_vm2 = vcmp.lt.f32.partialorder %v317_v25, 1.0  ;;  %v518_v42 = vadd.f32 -0.5, %v315_v23  ;;  %v519_v43 = vadd.f32 -0.5, %v316_v24  ;;  %v520_v44 = vadd.f32 -0.5, %v317_v25  ;;  %v384_v23 = vld [vmem:[%s1050_s2] sm:$0x1] (!%p526_p5) }
  0x69   : > { %v320_v45 = vand.u32 2147483647, %v312_v29  ;;  %v336_v46 = vmul.f32 0.5, %v312_v29  ;;  %v342_v47 = vmul.f32 %v334_v32, %v310_v16  ;;  %v521_v48 = vadd.f32 -0.5, %v318_v31 }
  0x6a   : > { %v321_v49 = vand.u32 2147483647, %v313_v30  ;;  %vm996_vm3 = vcmp.lt.f32.partialorder %v318_v31, 1.0  ;;  %v355_v51 = vsel %vm984_vm0, %v339_v35, %v518_v42  ;;  %v356_v52 = vsel %vm988_vm1, %v340_v36, %v519_v43 }
  0x6b   : > { %v337_v53 = vmul.f32 0.5, %v313_v30  ;;  %v343_v54 = vmul.f32 %v335_v39, %v311_v20  ;;  %v522_v55 = vadd.f32 -0.5, %v319_v34  ;;  %v357_v56 = vsel %vm992_vm2, %v341_v40, %v520_v44 }
  0x6c   : > { %v322_v57 = vand.u32 2147483647, %v314_v33  ;;  %vm1006_vm4 = vcmp.lt.f32.partialorder %v319_v34, 1.0  ;;  %v364_v59 = vadd.f32 %v356_v52, %v355_v51  ;;  %v338_v60 = vmul.f32 0.5, %v314_v33 }
  0x6d   : > { %v344_v61 = vmul.f32 %v336_v46, %v312_v29  ;;  %v523_v62 = vadd.f32 -0.5, %v320_v45  ;;  %v358_v63 = vsel %vm996_vm3, %v342_v47, %v521_v48  ;;  %vm328_vm5 = vcmp.lt.f32.partialorder %v320_v45, 1.0 }
  0x6e   : > { %v365_v0 = vadd.f32 %v364_v59, %v357_v56  ;;  %v345_v1 = vmul.f32 %v337_v53, %v313_v30  ;;  %v524_v2 = vadd.f32 -0.5, %v321_v49  ;;  %v359_v3 = vsel %vm1006_vm4, %v343_v54, %v522_v55 }
  0x6f   : > { %vm329_vm6 = vcmp.lt.f32.partialorder %v321_v49, 1.0  ;;  %v346_v5 = vmul.f32 %v338_v60, %v314_v33  ;;  %v525_v6 = vadd.f32 -0.5, %v322_v57  ;;  %v360_v7 = vsel %vm328_vm5, %v344_v61, %v523_v62 }
  0x70   : > { %v366_v4 = vadd.f32 %v365_v0, %v358_v63  ;;  %vm330_vm7 = vcmp.lt.f32.partialorder %v322_v57, 1.0  ;;  %v361_v9 = vsel %vm329_vm6, %v345_v1, %v524_v2 }
  0x71   : > { %v362_v11 = vsel %vm330_vm7, %v346_v5, %v525_v6 }
  0x72   : > { %v367_v8 = vadd.f32 %v366_v4, %v359_v3 }
  0x74   : > { %v368_v10 = vadd.f32 %v367_v8, %v360_v7 }
  0x76   : > { %v369_v12 = vadd.f32 %v368_v10, %v361_v9 }
  0x78   : > { %v370_v13 = vadd.f32 %v369_v12, %v362_v11 }
  0x7a   : > { %v371_v14 = vrot.slane %v370_v13, 4 }
  0x7c   : > { %v372_v15 = vadd.f32 %v371_v14, %v370_v13 }
  0x7e   : > { %v373_v16 = vrot.slane %v372_v15, 2 }
  0x80   : > { %v374_v17 = vadd.f32 %v373_v16, %v372_v15 }
  0x82   : > { %v375_v18 = vrot.slane %v374_v17, 1  ;;  %382 = sbr.rel (%p526_p5) target bundleno = 296 (0x128), region = 52 }
  0x84   : > { %v376_v20 = vadd.f32 %v375_v18, %v374_v17 }
  0x86   : > { %v377_v21 = vadd.f32 %v376_v20, %v363_v19 }
  0x88   : > { %378 = vst [vmem:[#allocation2] sm:$0x1] %v377_v21 }
  0x89   : > { %s393_s15 = scalar_select %p391_p9, 1, 0 }
  0x8b   : > { %v394_v26 = vstv %s393_s15 }
  0x8c   : > { %vm395_vm9 = vcmp.eq.s32.totalorder %v394_v26, 1 }
  0x8d   : > { %v396_v29 = vsel %vm395_vm9, %v392_v27, 0.0 }
  0x8f   : > { %v383_v22 = vld [vmem:[#allocation2] sm:$0x1] }
  0x90   : > { %v385_v24 = vmul.f32 %v384_v23, %v383_v22 }
  0x92   : > { %v387_v25 = vsel %vm386_vm8, %v385_v24, 0.0 }
  0x93   : > { %388 = vadd.xlane.f32.xlu0 %v387_v25 }
 0x120   : > { %v389_v28 = vpop.xlane.xlu0 %388 }
 0x121   : > { %v390_v30 = vmul.f32 0.00025, %v389_v28 }
 0x123   : > { %v397_v31 = vadd.f32 %v396_v29, %v390_v30 }
 0x125   : > { %v398_v32 = vmul.f32 0.5, %v397_v31 }
 0x127   : > { %400 = vst.msk [vmem:[%s285_s16] sm:$0x1] %vm399_vm10, %v398_v32 }
 0x128 PF: > { %s22_s3 = sadd.s32 1, %s740_s3   ;;  %s1069_s17 = smov %s716_s18 }
 0x129   : > { %p19_p2 = scmp.ge.s32.totalorder %s22_s3, 6   ;;  %s1070_s18 = smov %s720_s19 }
 0x12a   : > { %s1071_s19 = smov %s848_s12  ;;  %s1072_s20 = smov %s732_s22 }
 0x12b   : > { %s1073_s21 = smov %s736_s23  ;;  %s1074_s22 = smov %s1077_s25 }
 0x12c   : > { %s1075_s23 = smov %s1081_s26  ;;  %21 = sbr.rel (!%p19_p2) target bundleno = 10 (0xa), region = 97 }
 0x133   :  { %418 = vsyncpa [#allocation5], 1 }
 0x134   :  { %420 = vsyncpa [#allocation5 + $0x1], 1 }
 0x135   :  { %421 = vsyncpa [#allocation7], 1 }
 0x136   :  { %423 = vsyncpa [#allocation7 + $0x1], 1 }

</bundles_post_ra>
